<compile_context>
chip_gen: v5e
topology: v5e:2x2
jax: 0.10.0
libtpu: 0.0.40
codegen_flags: <defaults>
</compile_context>

<pallas_src>
import functools
import math

import jax
import jax.numpy as jnp
from jax.experimental import pallas as pl
from jax.experimental.pallas import tpu as pltpu

_LANES = 128


def _default_num_shards() -> int:
    # Shard the reduction across TensorCores only on chips with >1 TC per device
    # (v4/v5p megacore, v7x).  On single-TC chips (v5e/v6e) a size-2 leading axis is
    # just a second serial pass, so use 1.
    try:
        kind = jax.devices()[0].device_kind.lower()
    except Exception:
        return 1
    return 2 if any(t in kind for t in ("v7", "7x", "v4", "v5p")) else 1


def _disc_loss_kernel(real_ref, fake_ref, out_ref, acc_ref, *,
                      real_label, fake_label, block_rows):
    i = pl.program_id(1)  # streaming reduction axis

    @pl.when(i == 0)
    def _init():
        acc_ref[...] = jnp.zeros_like(acc_ref)

    r = real_ref[...].astype(jnp.float32)
    f = fake_ref[...].astype(jnp.float32)

    # BCEWithLogits(x, y) = max(x,0) - x*y + log1p(exp(-|x|))
    # Fuse the two log1p terms of the (real, fake) pair:
    #   log1p(e_r) + log1p(e_f) = log((1+e_r)(1+e_f)) = log1p(e_r + e_f + e_r*e_f)
    # -> 3 transcendental pushes per element pair instead of 4.
    e_r = jnp.exp(-jnp.abs(r))
    e_f = jnp.exp(-jnp.abs(f))
    loss = (jnp.maximum(r, 0.0) - r * real_label
            + jnp.maximum(f, 0.0) - f * fake_label
            + jnp.log1p(e_r + e_f + e_r * e_f))

    # Per-step sublane tree-sum into a single (8, 128) accumulator tile: same number
    # of VPU adds, but no (block_rows,128) accumulator reload/writeback each step.
    acc_ref[...] += loss.reshape(block_rows // 8, 8, _LANES).sum(axis=0)

    @pl.when(i == pl.num_programs(1) - 1)
    def _finalize():
        out_ref[...] = acc_ref[...]


def _run_disc_kernel(real2d, fake2d, *, num_shards, blocks_per_shard, block_rows,
                     real_label, fake_label):
    """Returns sum over all elements of bce(real, real_label) + bce(fake, fake_label)."""
    kernel = functools.partial(
        _disc_loss_kernel,
        real_label=real_label,
        fake_label=fake_label,
        block_rows=block_rows,
    )
    in_map = lambda p, i: (p * blocks_per_shard + i, 0)

    # Two inputs x double-buffered blocks + elementwise temporaries; leave headroom and
    # stay under every chip's physical VMEM (v7x: 64 MiB).
    block_bytes = block_rows * _LANES * real2d.dtype.itemsize
    vmem_limit = int(min(64 * 2**20, max(32 * 2**20, 10 * block_bytes + (2 << 20))))

    partial_sums = pl.pallas_call(
        kernel,
        out_shape=jax.ShapeDtypeStruct((num_shards * 8, _LANES), jnp.float32),
        grid_spec=pltpu.PrefetchScalarGridSpec(
            num_scalar_prefetch=0,
            grid=(num_shards, blocks_per_shard),
            in_specs=[
                pl.BlockSpec((block_rows, _LANES), in_map),
                pl.BlockSpec((block_rows, _LANES), in_map),
            ],
            out_specs=pl.BlockSpec((8, _LANES), lambda p, i: (p, 0)),
            scratch_shapes=[pltpu.VMEM((8, _LANES), jnp.float32)],
        ),
        compiler_params=pltpu.CompilerParams(
            dimension_semantics=("parallel", "arbitrary"),
            vmem_limit_bytes=vmem_limit,
        ),
    )(real2d, fake2d)
    return jnp.sum(partial_sums)


def _bce_pair_sum(r, f, real_label, fake_label):
    """Plain-jnp sum of the element-wise losses (used only for the small ragged tail)."""
    r = r.astype(jnp.float32)
    f = f.astype(jnp.float32)

    def bce(x, y):
        return jnp.maximum(x, 0.0) - x * y + jnp.log1p(jnp.exp(-jnp.abs(x)))

    return jnp.sum(bce(r, real_label)) + jnp.sum(bce(f, fake_label))


def discriminator_loss(real_predictions, fake_predictions,
                       label_smoothing: float = 0.0, *,
                       block_rows: int = 4096, num_shards: int | None = None):
    """Pallas implementation of DiscriminatorLoss.forward."""
    assert real_predictions.shape == fake_predictions.shape, (
        "this kernel assumes matching real/fake prediction shapes")
    n = int(real_predictions.size)
    assert n > 0
    if num_shards is None:
        num_shards = _default_num_shards()
    block_rows = max(8, int(block_rows))

    real_label = float(1.0 - label_smoothing)
    fake_label = float(label_smoothing)

    real_flat = real_predictions.reshape(-1)
    fake_flat = fake_predictions.reshape(-1)

    m_full = n // _LANES  # number of complete 128-lane rows

    if m_full >= 8 * num_shards:
        # Main path: stream the largest aligned prefix through the kernel (no padding
        # copy, no in-kernel masking); the < one-block-per-shard tail is summed in jnp.
        rows_per_shard = m_full // num_shards
        blocks_per_shard = pl.cdiv(rows_per_shard, block_rows)
        br = max(8, (rows_per_shard // blocks_per_shard) // 8 * 8)
        m_main = num_shards * blocks_per_shard * br
        n_main = m_main * _LANES

        real2d = real_flat[:n_main].reshape(m_main, _LANES)
        fake2d = fake_flat[:n_main].reshape(m_main, _LANES)

        total = _run_disc_kernel(
            real2d, fake2d,
            num_shards=num_shards, blocks_per_shard=blocks_per_shard, block_rows=br,
            real_label=real_label, fake_label=fake_label)
        if n_main < n:
            total = total + _bce_pair_sum(real_flat[n_main:], fake_flat[n_main:],
                                          real_label, fake_label)
    else:
        # Tiny input: zero-pad to one (8, 128) block.  Each padded zero contributes
        # exactly ln(2) to each BCE term, so subtract the constant instead of masking.
        pad = 8 * _LANES - n
        real2d = jnp.pad(real_flat, (0, pad)).reshape(8, _LANES)
        fake2d = jnp.pad(fake_flat, (0, pad)).reshape(8, _LANES)
        total = _run_disc_kernel(
            real2d, fake2d,
            num_shards=1, blocks_per_shard=1, block_rows=8,
            real_label=real_label, fake_label=fake_label)
        total = total - 2.0 * pad * math.log(2.0)

    return total / (2.0 * n)


def _reference_loss(real, fake, label_smoothing=0.0):
    """Pure-JAX reference (matches torch BCEWithLogitsLoss semantics)."""
    def bce_mean(x, y):
        x = x.astype(jnp.float32)
        return jnp.mean(jnp.maximum(x, 0.0) - x * y + jnp.log1p(jnp.exp(-jnp.abs(x))))
    s = label_smoothing
    return (bce_mean(real, 1.0 - s) + bce_mean(fake, s)) * 0.5


if __name__ == "__main__":
    key = jax.random.PRNGKey(0)
    k1, k2, k3, k4, k5, k6 = jax.random.split(key, 6)
    label_smoothing = 0.1

    # 1) Aligned NCHW discriminator logits: batch=2, channels=4, spatial 16x16.
    shape = (2, 4, 16, 16)
    real = jax.random.normal(k1, shape, dtype=jnp.float32)
    fake = jax.random.normal(k2, shape, dtype=jnp.float32)
    loss = jax.block_until_ready(discriminator_loss(real, fake, label_smoothing))
    ref = _reference_loss(real, fake, label_smoothing)
    assert jnp.allclose(loss, ref, rtol=1e-5, atol=1e-5), (loss, ref)

    # 2) Ragged medium shape (3*5*25*14 = 5250 elems): kernel prefix + jnp tail path.
    shape2 = (3, 5, 25, 14)
    real2 = jax.random.normal(k3, shape2, dtype=jnp.float32)
    fake2 = jax.random.normal(k4, shape2, dtype=jnp.float32)
    loss2 = jax.block_until_ready(discriminator_loss(real2, fake2, label_smoothing))
    ref2 = _reference_loss(real2, fake2, label_smoothing)
    assert jnp.allclose(loss2, ref2, rtol=1e-5, atol=1e-5), (loss2, ref2)

    # 3) Tiny ragged shape (2*3*7*11 = 462 elems): padded single-block + constant fix.
    shape3 = (2, 3, 7, 11)
    real3 = jax.random.normal(k5, shape3, dtype=jnp.float32)
    fake3 = jax.random.normal(k6, shape3, dtype=jnp.float32)
    loss3 = jax.block_until_ready(discriminator_loss(real3, fake3, label_smoothing))
    ref3 = _reference_loss(real3, fake3, label_smoothing)
    assert jnp.allclose(loss3, ref3, rtol=1e-5, atol=1e-5), (loss3, ref3)

    print("KERNEL_OK")
</pallas_src>

<mosaic_0001>
module attributes {stable_mosaic.version = 11 : i64} {
  func.func @_disc_loss_kernel(%arg0: i32, %arg1: i32, %arg2: memref<16x128xf32, #tpu.memory_space<vmem>>, %arg3: memref<16x128xf32, #tpu.memory_space<vmem>>, %arg4: memref<8x128xf32, #tpu.memory_space<vmem>>, %arg5: memref<8x128xf32, #tpu.memory_space<vmem>>) attributes {dimension_semantics = [#tpu.dimension_semantics<parallel>, #tpu.dimension_semantics<arbitrary>], iteration_bounds = array<i64: 1, 1>, scalar_prefetch = 0 : i64, scratch_operands = 1 : i64, tpu.core_type = #tpu.core_type<tc>, window_params = [{transform_indices = @transform_0, window_bounds = array<i64: 16, 128>}, {transform_indices = @transform_1, window_bounds = array<i64: 16, 128>}, {transform_indices = @transform_2, window_bounds = array<i64: 8, 128>}]} {
    %c0_i32 = arith.constant 0 : i32
    %0 = arith.cmpi eq, %arg1, %c0_i32 : i32
    %1 = arith.extui %0 : i1 to i32
    %c0_i32_0 = arith.constant 0 : i32
    %2 = arith.cmpi ne, %1, %c0_i32_0 : i32
    scf.if %2 {
      %cst_16 = arith.constant 0.000000e+00 : f32
      %37 = vector.broadcast %cst_16 : f32 to vector<8x128xf32>
      %c0_17 = arith.constant 0 : index
      %c0_18 = arith.constant 0 : index
      %38 = vector.load %arg5[%c0_17, %c0_18] : memref<8x128xf32, #tpu.memory_space<vmem>>, vector<8x128xf32>
      tpu.vector_store %arg5[%c0_17, %c0_18], %37 {strides = array<i32>} : memref<8x128xf32, #tpu.memory_space<vmem>>, vector<8x128xf32>,
    } else {
    }
    %c0 = arith.constant 0 : index
    %c0_1 = arith.constant 0 : index
    %3 = vector.load %arg2[%c0, %c0_1] : memref<16x128xf32, #tpu.memory_space<vmem>>, vector<16x128xf32>
    %c0_2 = arith.constant 0 : index
    %c0_3 = arith.constant 0 : index
    %4 = vector.load %arg3[%c0_2, %c0_3] : memref<16x128xf32, #tpu.memory_space<vmem>>, vector<16x128xf32>
    %5 = math.absf %3 : vector<16x128xf32>
    %cst = arith.constant 0.000000e+00 : f32
    %6 = vector.broadcast %cst : f32 to vector<16x128xf32>
    %7 = arith.subf %6, %5 : vector<16x128xf32>
    %8 = math.exp %7 : vector<16x128xf32>
    %9 = math.absf %4 : vector<16x128xf32>
    %cst_4 = arith.constant 0.000000e+00 : f32
    %10 = vector.broadcast %cst_4 : f32 to vector<16x128xf32>
    %11 = arith.subf %10, %9 : vector<16x128xf32>
    %12 = math.exp %11 : vector<16x128xf32>
    %cst_5 = arith.constant 0.000000e+00 : f32
    %13 = vector.broadcast %cst_5 : f32 to vector<16x128xf32>
    %14 = arith.maximumf %3, %13 : vector<16x128xf32>
    %cst_6 = arith.constant 0.899999976 : f32
    %15 = vector.broadcast %cst_6 : f32 to vector<16x128xf32>
    %16 = arith.mulf %3, %15 : vector<16x128xf32>
    %17 = arith.subf %14, %16 : vector<16x128xf32>
    %cst_7 = arith.constant 0.000000e+00 : f32
    %18 = vector.broadcast %cst_7 : f32 to vector<16x128xf32>
    %19 = arith.maximumf %4, %18 : vector<16x128xf32>
    %20 = arith.addf %17, %19 : vector<16x128xf32>
    %cst_8 = arith.constant 1.000000e-01 : f32
    %21 = vector.broadcast %cst_8 : f32 to vector<16x128xf32>
    %22 = arith.mulf %4, %21 : vector<16x128xf32>
    %23 = arith.subf %20, %22 : vector<16x128xf32>
    %24 = arith.addf %8, %12 : vector<16x128xf32>
    %25 = arith.mulf %8, %12 : vector<16x128xf32>
    %26 = arith.addf %24, %25 : vector<16x128xf32>
    %27 = math.log1p %26 : vector<16x128xf32>
    %28 = arith.addf %23, %27 : vector<16x128xf32>
    %c0_9 = arith.constant 0 : index
    %c0_10 = arith.constant 0 : index
    %29 = vector.load %arg5[%c0_9, %c0_10] : memref<8x128xf32, #tpu.memory_space<vmem>>, vector<8x128xf32>
    %30 = vector.shape_cast %28 : vector<16x128xf32> to vector<2x8x128xf32>
    %cst_11 = arith.constant dense<0.000000e+00> : vector<8x128xf32>
    %31 = vector.multi_reduction <add>, %30, %cst_11 [0] : vector<2x8x128xf32> to vector<8x128xf32>
    %32 = arith.addf %29, %31 : vector<8x128xf32>
    %c0_12 = arith.constant 0 : index
    %c0_13 = arith.constant 0 : index
    %33 = vector.load %arg5[%c0_12, %c0_13] : memref<8x128xf32, #tpu.memory_space<vmem>>, vector<8x128xf32>
    tpu.vector_store %arg5[%c0_12, %c0_13], %32 {strides = array<i32>} : memref<8x128xf32, #tpu.memory_space<vmem>>, vector<8x128xf32>,
    %c0_i32_14 = arith.constant 0 : i32
    %34 = arith.cmpi eq, %arg1, %c0_i32_14 : i32
    %35 = arith.extui %34 : i1 to i32
    %c0_i32_15 = arith.constant 0 : i32
    %36 = arith.cmpi ne, %35, %c0_i32_15 : i32
    scf.if %36 {
      %c0_16 = arith.constant 0 : index
      %c0_17 = arith.constant 0 : index
      %37 = vector.load %arg5[%c0_16, %c0_17] : memref<8x128xf32, #tpu.memory_space<vmem>>, vector<8x128xf32>
      %c0_18 = arith.constant 0 : index
      %c0_19 = arith.constant 0 : index
      %38 = vector.load %arg4[%c0_18, %c0_19] : memref<8x128xf32, #tpu.memory_space<vmem>>, vector<8x128xf32>
      tpu.vector_store %arg4[%c0_18, %c0_19], %37 {strides = array<i32>} : memref<8x128xf32, #tpu.memory_space<vmem>>, vector<8x128xf32>,
    } else {
    }
    return
  }
  func.func @transform_0(%arg0: i32, %arg1: i32) -> (i32, i32) {
    %c1_i32 = arith.constant 1 : i32
    %0 = arith.muli %arg0, %c1_i32 : i32
    %1 = arith.addi %0, %arg1 : i32
    %c0_i32 = arith.constant 0 : i32
    %c0_i32_0 = arith.constant 0 : i32
    return %1, %c0_i32 : i32, i32
  }
  func.func @transform_1(%arg0: i32, %arg1: i32) -> (i32, i32) {
    %c1_i32 = arith.constant 1 : i32
    %0 = arith.muli %arg0, %c1_i32 : i32
    %1 = arith.addi %0, %arg1 : i32
    %c0_i32 = arith.constant 0 : i32
    %c0_i32_0 = arith.constant 0 : i32
    return %1, %c0_i32 : i32, i32
  }
  func.func @transform_2(%arg0: i32, %arg1: i32) -> (i32, i32) {
    %c0_i32 = arith.constant 0 : i32
    %c0_i32_0 = arith.constant 0 : i32
    return %arg0, %c0_i32 : i32, i32
  }
}

</mosaic_0001>

<bundles_post_ra>
// kernel: tpu_custom_call.1
= control target key start
LH: loop header
LB: loop body
LE: loop exit
PB: predicated region body
PF: predicated region fallthrough
CT: control target
= control target key end

     0   :  { %7 = vsyncpa [#allocation4], 0  ;;  %s272_s0 = inlined_call_operand.hbm [shape: f32[16,128], index: 0, kind: input, shape index: {}]   ;;  %s273_s1 = inlined_call_operand.hbm [shape: f32[16,128], index: 1, kind: input, shape index: {}]   ;;  %s274_s2 = inlined_call_operand.hbm [shape: f32[8,128], index: 2, kind: output, shape index: {}]  }
   0x1   :  { %8 = vsyncpa [#allocation7], 0 }
   0x2   :  { %9 = vsyncpa [#allocation5], 0  ;;  %s18_s11 = sshll.u32 %s272_s0, 4  ;;  %s243_s12 = smov [#allocation3]   ;;  %s19_s11 = int_to_ptr.hbm [resolvable:$true] %s18_s11 }
   0x3   :  { %s20_s13 = sshll.u32 %s243_s12, 4  ;;  %s35_s16 = sshll.u32 %s273_s1, 4  ;;  %s21_s13 = int_to_ptr.vmem [resolvable:$true] %s20_s13  ;;  %s36_s16 = int_to_ptr.hbm [resolvable:$true] %s35_s16 }
   0x4   :  { %s244_s17 = smov 128   ;;  %s245_s18 = smov 8  }
   0x5   :  { %26 = dma.hbm_to_vmem [thread:$0]  %s19_s11, 256, %s21_s13, [#allocation4], %s244_s17, %s244_s17, %s245_s18  }
   0x6   :  { %s246_s19 = smov [#allocation6]  }
   0x7   :  { %s37_s20 = sshll.u32 %s246_s19, 4  ;;  %s38_s20 = int_to_ptr.vmem [resolvable:$true] %s37_s20 }
   0x8   :  { %43 = dma.hbm_to_vmem [thread:$0]  %s36_s16, 256, %s38_s20, [#allocation7], %s244_s17, %s244_s17, %s245_s18  }
   0x9   :  { %237 = dma.done.wait [#allocation4], 256  }
   0xa   :  { %238 = vsyncadd [#allocation4], 4294967040 }
   0xb   :  { %239 = dma.done.wait [#allocation7], 256  }
   0xc   :  { %240 = vsyncadd [#allocation7], 4294967040  ;;  %v61_v0 = vld [vmem:[#allocation3] sm:$0xff]  ;;  %v62_v1 = vld [vmem:[#allocation3 + $0x8] sm:$0xff]  ;;  %s247_s0 = smov [#allocation8]   ;;  %s137_s23 = sshll.u32 %s274_s2, 4  ;;  %s138_s23 = int_to_ptr.hbm [resolvable:$true] %s137_s23 }
   0xd   :  { %v63_v2 = vld [vmem:[#allocation6] sm:$0xff]  ;;  %v64_v3 = vld [vmem:[#allocation6 + $0x8] sm:$0xff]  ;;  %v65_v4 = vand.u32 2147483647, %v61_v0  ;;  %v66_v5 = vand.u32 2147483647, %v62_v1 }
   0xe   :  { %v73_v6 = vand.u32 2147483647, %v63_v2  ;;  %v74_v7 = vand.u32 2147483647, %v64_v3  ;;  %v81_v20 = vmax.f32 %v61_v0, 0.0  ;;  %v82_v24 = vmax.f32 %v62_v1, 0.0 }
   0xf   :  { %v67_v8 = vsub.f32 0.0, %v65_v4  ;;  %v68_v9 = vsub.f32 0.0, %v66_v5  ;;  %v83_v21 = vmul.f32 0.9, %v61_v0  ;;  %v84_v25 = vmul.f32 0.9, %v62_v1 }
  0x10   :  { %v75_v10 = vsub.f32 0.0, %v73_v6  ;;  %v76_v11 = vsub.f32 0.0, %v74_v7  ;;  %v87_v31 = vmax.f32 %v63_v2, 0.0  ;;  %v88_v35 = vmax.f32 %v64_v3, 0.0  ;;  %s135_s1 = sshll.u32 %s247_s0, 4  ;;  %s136_s1 = int_to_ptr.vmem [resolvable:$true] %s135_s1 }
  0x11   :  { %v69_v12 = vmul.f32 1.442695, %v67_v8  ;;  %v71_v13 = vmul.f32 1.442695, %v68_v9  ;;  %v85_v30 = vsub.f32 %v81_v20, %v83_v21  ;;  %v86_v34 = vsub.f32 %v82_v24, %v84_v25 }
  0x12   :  { %v77_v14 = vmul.f32 1.442695, %v75_v10  ;;  %v79_v15 = vmul.f32 1.442695, %v76_v11  ;;  %v91_v40 = vmul.f32 0.1, %v63_v2 }
  0x13   :  { %153 = vpow2.f32 %v69_v12  ;;  %v89_v39 = vadd.f32 %v87_v31, %v85_v30  ;;  %v90_v43 = vadd.f32 %v88_v35, %v86_v34  ;;  %v92_v44 = vmul.f32 0.1, %v64_v3 }
  0x14   :  { %155 = vpow2.f32 %v71_v13 }
  0x15   :  { %157 = vpow2.f32 %v77_v14  ;;  %v93_v48 = vsub.f32 %v89_v39, %v91_v40  ;;  %v94_v51 = vsub.f32 %v90_v43, %v92_v44 }
  0x16   :  { %159 = vpow2.f32 %v79_v15 }
  0x19   :  { %v154_v16 = vpop.eup %153 }
  0x1a   :  { %v156_v17 = vpop.eup %155 }
  0x1b   :  { %v158_v18 = vpop.eup %157 }
  0x1c   :  { %v160_v19 = vpop.eup %159  ;;  %v95_v22 = vadd.f32 %v158_v18, %v154_v16  ;;  %v97_v23 = vmul.f32 %v158_v18, %v154_v16 }
  0x1d   :  { %v96_v26 = vadd.f32 %v160_v19, %v156_v17  ;;  %v98_v27 = vmul.f32 %v160_v19, %v156_v17 }
  0x1e   :  { %v99_v28 = vadd.f32 %v97_v23, %v95_v22 }
  0x1f   :  { %v100_v29 = vadd.f32 %v98_v27, %v96_v26 }
  0x20   :  { %v101_v32 = vadd.f32 1.0, %v99_v28  ;;  %v104_v33 = vmul.f32 -0.5, %v99_v28  ;;  %v107_v41 = vand.u32 2147483647, %v99_v28 }
  0x21   :  { %v110_v36 = vadd.f32 1.0, %v100_v29  ;;  %v113_v37 = vmul.f32 -0.5, %v100_v29  ;;  %v116_v45 = vand.u32 2147483647, %v100_v29 }
  0x22   :  { %161 = vlog2.f32 %v101_v32  ;;  %v105_v38 = vadd.f32 1.0, %v104_v33  ;;  %vm108_vm0 = vcmp.lt.f32.partialorder %v107_v41, 0.0004427343 }
  0x23   :  { %163 = vlog2.f32 %v110_v36  ;;  %v114_v42 = vadd.f32 1.0, %v113_v37  ;;  %vm117_vm1 = vcmp.lt.f32.partialorder %v116_v45, 0.0004427343 }
  0x24   :  { %v106_v46 = vmul.f32 %v105_v38, %v99_v28 }
  0x25   :  { %v115_v49 = vmul.f32 %v114_v42, %v100_v29 }
  0x28   :  { %v162_v47 = vpop.eup %161 }
  0x29   :  { %v164_v50 = vpop.eup %163  ;;  %v103_v52 = vmul.f32 0.6931472, %v162_v47 }
  0x2a   :  { %v112_v53 = vmul.f32 0.6931472, %v164_v50 }
  0x2b   :  { %v109_v54 = vsel %vm108_vm0, %v106_v46, %v103_v52 }
  0x2c   :  { %v118_v55 = vsel %vm117_vm1, %v115_v49, %v112_v53  ;;  %v119_v56 = vadd.f32 %v109_v54, %v93_v48 }
  0x2d   :  { %v120_v57 = vadd.f32 %v118_v55, %v94_v51 }
  0x2f   :  { %v122_v58 = vadd.f32 %v120_v57, %v119_v56 }
  0x31   :  { %129 = vst [vmem:[#allocation8] sm:$0xff] %v122_v58 }
  0x32   :  { %140 = dma.vmem_to_hbm [thread:$0]  %s136_s1, 128, %s138_s23, [#allocation5]  }
  0x33   :  { %241 = dma.done.wait [#allocation5], 128  }
  0x34   :  { %242 = vsyncadd [#allocation5], 4294967168 }
  0x35   :  { %145 = vsyncpa [#allocation4], 1 }
  0x36   :  { %146 = vsyncpa [#allocation7], 1 }
  0x37   :  { %147 = vsyncpa [#allocation5], 1 }

</bundles_post_ra>
